<compile_context>
chip_gen: v6e
topology: v6e:2x2x1
jax: 0.10.0
libtpu: 0.0.40
codegen_flags: <defaults>
</compile_context>

<pallas_src>
import jax
import jax.numpy as jnp
from jax.experimental import pallas as pl
from jax.experimental.pallas import tpu as pltpu


# ----------------------------- stage 1 kernel -------------------------------
def conv_bn_silu_kernel(x_ref, w_ref, bias_ref, o_ref):
    # x_ref: (TM, C1), w_ref: (C1, C2) with BN scale pre-folded, bias_ref: (1, C2)
    # NOTE: with tiny C1 the MXU runs at low utilization, but this stage is
    # HBM-bandwidth bound so the matmul cost is negligible either way.
    y = jnp.dot(x_ref[...], w_ref[...], preferred_element_type=jnp.float32)
    y = y + bias_ref[...]                      # fused eval-mode BatchNorm (scale folded into w)
    o_ref[...] = y * jax.nn.sigmoid(y)         # SiLU


# ----------------------------- stage 2 kernel -------------------------------
def simam_se_kernel(dyn_ref, y_ref, w1t_ref, w2t_ref, o_ref):
    # dyn_ref: (1,1) f32 in SMEM (dynamic lambda, precomputed from the global mean)
    # y_ref / o_ref: (1, bh, bw, C) -- one 2x2 quadrant, channels on the lane axis.
    y = y_ref[...]
    C = y.shape[3]
    L = y.shape[1] * y.shape[2]
    inv_L = 1.0 / float(L)
    inv_n = 1.0 / float(max(L - 1, 1))
    dyn_lambda = dyn_ref[0, 0]

    # SimAM statistics in a single pass: mu = mean(y); s = sum((y-mu)^2) = sum(y^2) - L*mu^2
    sum_y = jnp.sum(y, axis=(1, 2), keepdims=True)            # (1,1,1,C)
    sum_y2 = jnp.sum(y * y, axis=(1, 2), keepdims=True)       # (1,1,1,C)
    mu = sum_y * inv_L
    s = jnp.maximum(sum_y2 - sum_y * mu, 0.0)
    d2 = (y - mu) ** 2
    inv_den = pl.reciprocal(4.0 * (s * inv_n + dyn_lambda), approx=True)   # per-channel, EUP
    att = d2 * inv_den + 0.5
    enhanced = y * jax.nn.sigmoid(att)

    # SE block (weights shared across quadrants): GAP -> FC -> ReLU -> FC -> sigmoid gate
    pooled = jnp.sum(enhanced, axis=(1, 2)) * inv_L            # (1, C)
    h = jnp.maximum(
        jnp.dot(pooled, w1t_ref[...], preferred_element_type=jnp.float32), 0.0)   # (1, Cr)
    gate = jax.nn.sigmoid(
        jnp.dot(h, w2t_ref[...], preferred_element_type=jnp.float32))             # (1, C)

    o_ref[...] = enhanced * gate.reshape(1, 1, 1, C)


# -------------------------------- helpers -----------------------------------
def _pick_row_tile(m):
    # Prefer large tiles (better HBM roofline / fewer grid-step overheads), but keep
    # >= 2 grid steps when possible so both v7x TensorCores get work.
    for t in (2048, 1024, 512, 256, 128, 64, 32, 16, 8):
        if m % t == 0 and m // t >= 2:
            return t
    return m  # fallback: single full block (block == full dim exception)


_VMEM_LIMIT = 48 * 1024 * 1024  # fits all generations (v7x has 64 MiB physical)


# -------------------------------- wrapper -----------------------------------
def dsws_conv2x2(x_nchw, conv_w, bn_gamma, bn_beta, bn_mean, bn_var,
                 se_w1, se_w2, *, e_lambda=1e-4, bn_eps=1e-5):
    B, C1, H, W = x_nchw.shape
    C2 = conv_w.shape[0]
    Cr = se_w1.shape[0]

    # ---- stage 1: 1x1 conv + BN(eval, folded) + SiLU as a tiled matmul ----
    x_rows = jnp.transpose(x_nchw, (0, 2, 3, 1)).reshape(B * H * W, C1)   # NCHW -> NHWC rows
    inv_std = bn_gamma / jnp.sqrt(bn_var + bn_eps)
    w_folded = conv_w.reshape(C2, C1).T * inv_std[None, :]                # (C1, C2), BN scale folded
    bias = (bn_beta - bn_mean * inv_std).reshape(1, C2)

    M = B * H * W
    TM = _pick_row_tile(M)
    y_rows = pl.pallas_call(
        conv_bn_silu_kernel,
        out_shape=jax.ShapeDtypeStruct((M, C2), jnp.float32),
        grid=(M // TM,),
        in_specs=[
            pl.BlockSpec((TM, C1), lambda i: (i, 0)),
            pl.BlockSpec((C1, C2), lambda i: (0, 0)),
            pl.BlockSpec((1, C2), lambda i: (0, 0)),
        ],
        out_specs=pl.BlockSpec((TM, C2), lambda i: (i, 0)),
        compiler_params=pltpu.CompilerParams(
            dimension_semantics=("parallel",),
            vmem_limit_bytes=_VMEM_LIMIT),
    )(x_rows, w_folded, bias)

    # (B*H*W, C2) row-major IS NHWC -> free reshape, no data movement.
    y = y_rows.reshape(B, H, W, C2)

    # ---- stage 2: pad to even H/W, SimAM + SE per 2x2 quadrant, read straight from NHWC ----
    pad_h = (2 - H % 2) % 2
    pad_w = (2 - W % 2) % 2
    if pad_h or pad_w:
        y = jnp.pad(y, ((0, 0), (0, pad_h), (0, pad_w), (0, 0)))
    Hp, Wp = H + pad_h, W + pad_w
    bh, bw = Hp // 2, Wp // 2
    # NOTE: quadrant BlockSpec requires bw % 8 == 0 (sublane tiling); typical CNN
    # feature maps satisfy this.  (Otherwise further spatial padding would be needed.)

    # Dynamic lambda from the global mean of the whole (zero-padded) activation tensor,
    # exactly as the reference (x.mean() over the padded tensor).
    global_mean = jnp.mean(y)
    dyn_lambda = (e_lambda * jnp.log1p(jnp.abs(global_mean))).reshape(1, 1).astype(jnp.float32)

    out_nhwc = pl.pallas_call(
        simam_se_kernel,
        out_shape=jax.ShapeDtypeStruct((B, Hp, Wp, C2), jnp.float32),
        grid=(B, 2, 2),
        in_specs=[
            pl.BlockSpec(memory_space=pltpu.MemorySpace.SMEM),             # dyn_lambda scalar
            pl.BlockSpec((1, bh, bw, C2), lambda b, i, j: (b, i, j, 0)),   # quadrant (b,i,j)
            pl.BlockSpec((C2, Cr), lambda b, i, j: (0, 0)),                # SE w1^T (resident)
            pl.BlockSpec((Cr, C2), lambda b, i, j: (0, 0)),                # SE w2^T (resident)
        ],
        out_specs=pl.BlockSpec((1, bh, bw, C2), lambda b, i, j: (b, i, j, 0)),
        compiler_params=pltpu.CompilerParams(
            dimension_semantics=("parallel", "parallel", "parallel"),
            vmem_limit_bytes=_VMEM_LIMIT),
    )(dyn_lambda, y, se_w1.T, se_w2.T)

    out = out_nhwc
    if pad_h or pad_w:
        out = out[:, :H, :W, :]
    return jnp.transpose(out, (0, 3, 1, 2))   # back to NCHW (PyTorch convention)


if __name__ == "__main__":
    key = jax.random.PRNGKey(0)
    # C2=128 keeps the lane axis dense (and SEBlock reduction=16 -> Cr=8); shapes stay small.
    B, C1, C2, H, W = 2, 4, 128, 16, 16
    Cr = C2 // 16

    k1, k2, k3, k4 = jax.random.split(key, 4)
    x = jax.random.normal(k1, (B, C1, H, W), jnp.float32)

    # deterministic parameter init (synthetic; matches module shapes)
    conv_w = 0.1 * jax.random.normal(k2, (C2, C1, 1, 1), jnp.float32)   # Conv2d(c1,c2,1,bias=False)
    bn_gamma = jnp.ones((C2,), jnp.float32)
    bn_beta = jnp.zeros((C2,), jnp.float32)
    bn_mean = jnp.zeros((C2,), jnp.float32)
    bn_var = jnp.ones((C2,), jnp.float32)
    se_w1 = 0.1 * jax.random.normal(k3, (Cr, C2), jnp.float32)          # Linear(C2, C2//16, bias=False)
    se_w2 = 0.1 * jax.random.normal(k4, (C2, Cr), jnp.float32)          # Linear(C2//16, C2, bias=False)

    fwd = jax.jit(dsws_conv2x2)
    out = fwd(x, conv_w, bn_gamma, bn_beta, bn_mean, bn_var, se_w1, se_w2)
    jax.block_until_ready(out)
    assert out.shape == (B, C2, H, W)
    print("KERNEL_OK")
</pallas_src>

<mosaic_0001>
module attributes {stable_mosaic.version = 11 : i64} {
  func.func @conv_bn_silu_kernel(%arg0: i32, %arg1: memref<256x4xf32, #tpu.memory_space<vmem>>, %arg2: memref<4x128xf32, #tpu.memory_space<vmem>>, %arg3: memref<1x128xf32, #tpu.memory_space<vmem>>, %arg4: memref<256x128xf32, #tpu.memory_space<vmem>>) attributes {dimension_semantics = [#tpu.dimension_semantics<parallel>], iteration_bounds = array<i64: 2>, scalar_prefetch = 0 : i64, scratch_operands = 0 : i64, tpu.core_type = #tpu.core_type<tc>, window_params = [{transform_indices = @transform_0, window_bounds = array<i64: 256, 4>}, {pipeline_mode = #tpu.pipeline_mode<synchronous>, transform_indices = @transform_1, window_bounds = array<i64: 4, 128>}, {pipeline_mode = #tpu.pipeline_mode<synchronous>, transform_indices = @transform_2, window_bounds = array<i64: 1, 128>}, {transform_indices = @transform_3, window_bounds = array<i64: 256, 128>}]} {
    %c0 = arith.constant 0 : index
    %c0_0 = arith.constant 0 : index
    %0 = vector.load %arg1[%c0, %c0_0] : memref<256x4xf32, #tpu.memory_space<vmem>>, vector<256x4xf32>
    %c0_1 = arith.constant 0 : index
    %c0_2 = arith.constant 0 : index
    %1 = vector.load %arg2[%c0_1, %c0_2] : memref<4x128xf32, #tpu.memory_space<vmem>>, vector<4x128xf32>
    %cst = arith.constant dense<0.000000e+00> : vector<256x128xf32>
    %2 = tpu.matmul %0, %1, %cst {dimension_numbers = #tpu.dot_dimension_numbers<[1], [0], [0], [1], [0, 0, 1, 1], [], []>} : vector<256x4xf32>, vector<4x128xf32>, vector<256x128xf32> -> vector<256x128xf32>
    %c0_3 = arith.constant 0 : index
    %c0_4 = arith.constant 0 : index
    %3 = vector.load %arg3[%c0_3, %c0_4] : memref<1x128xf32, #tpu.memory_space<vmem>>, vector<1x128xf32>
    %4 = vector.broadcast %3 : vector<1x128xf32> to vector<256x128xf32>
    %5 = arith.addf %2, %4 : vector<256x128xf32>
    %6 = arith.negf %5 : vector<256x128xf32>
    %7 = math.exp %6 : vector<256x128xf32>
    %cst_5 = arith.constant 1.000000e+00 : f32
    %8 = vector.broadcast %cst_5 : f32 to vector<256x128xf32>
    %9 = arith.addf %8, %7 : vector<256x128xf32>
    %10 = arith.divf %8, %9 : vector<256x128xf32>
    %11 = arith.mulf %5, %10 : vector<256x128xf32>
    %c0_6 = arith.constant 0 : index
    %c0_7 = arith.constant 0 : index
    %12 = vector.load %arg4[%c0_6, %c0_7] : memref<256x128xf32, #tpu.memory_space<vmem>>, vector<256x128xf32>
    tpu.vector_store %arg4[%c0_6, %c0_7], %11 {strides = array<i32>} : memref<256x128xf32, #tpu.memory_space<vmem>>, vector<256x128xf32>,
    return
  }
  func.func @transform_0(%arg0: i32) -> (i32, i32) {
    %c0_i32 = arith.constant 0 : i32
    %c0_i32_0 = arith.constant 0 : i32
    return %arg0, %c0_i32 : i32, i32
  }
  func.func @transform_1(%arg0: i32) -> (i32, i32) {
    %c0_i32 = arith.constant 0 : i32
    %c0_i32_0 = arith.constant 0 : i32
    %c0_i32_1 = arith.constant 0 : i32
    return %c0_i32, %c0_i32_0 : i32, i32
  }
  func.func @transform_2(%arg0: i32) -> (i32, i32) {
    %c0_i32 = arith.constant 0 : i32
    %c0_i32_0 = arith.constant 0 : i32
    %c0_i32_1 = arith.constant 0 : i32
    return %c0_i32, %c0_i32_0 : i32, i32
  }
  func.func @transform_3(%arg0: i32) -> (i32, i32) {
    %c0_i32 = arith.constant 0 : i32
    %c0_i32_0 = arith.constant 0 : i32
    return %arg0, %c0_i32 : i32, i32
  }
}

module attributes {stable_mosaic.version = 11 : i64} {
  func.func @simam_se_kernel(%arg0: i32, %arg1: i32, %arg2: i32, %arg3: memref<1x1xf32, #tpu.memory_space<smem>>, %arg4: memref<1x8x8x128xf32, #tpu.memory_space<vmem>>, %arg5: memref<128x8xf32, #tpu.memory_space<vmem>>, %arg6: memref<8x128xf32, #tpu.memory_space<vmem>>, %arg7: memref<1x8x8x128xf32, #tpu.memory_space<vmem>>) attributes {dimension_semantics = [#tpu.dimension_semantics<parallel>, #tpu.dimension_semantics<parallel>, #tpu.dimension_semantics<parallel>], iteration_bounds = array<i64: 2, 2, 2>, scalar_prefetch = 0 : i64, scratch_operands = 0 : i64, tpu.core_type = #tpu.core_type<tc>, window_params = [{transform_indices = @transform_0, window_bounds = array<i64: 1, 1>}, {transform_indices = @transform_1, window_bounds = array<i64: 1, 8, 8, 128>}, {pipeline_mode = #tpu.pipeline_mode<synchronous>, transform_indices = @transform_2, window_bounds = array<i64: 128, 8>}, {pipeline_mode = #tpu.pipeline_mode<synchronous>, transform_indices = @transform_3, window_bounds = array<i64: 8, 128>}, {transform_indices = @transform_4, window_bounds = array<i64: 1, 8, 8, 128>}]} {
    %c0 = arith.constant 0 : index
    %c0_0 = arith.constant 0 : index
    %c0_1 = arith.constant 0 : index
    %c0_2 = arith.constant 0 : index
    %0 = vector.load %arg4[%c0, %c0_0, %c0_1, %c0_2] : memref<1x8x8x128xf32, #tpu.memory_space<vmem>>, vector<1x8x8x128xf32>
    %c0_3 = arith.constant 0 : index
    %c0_4 = arith.constant 0 : index
    %1 = memref.load %arg3[%c0_3, %c0_4] : memref<1x1xf32, #tpu.memory_space<smem>>
    %cst = arith.constant dense<0.000000e+00> : vector<1x128xf32>
    %2 = vector.multi_reduction <add>, %0, %cst [1, 2] : vector<1x8x8x128xf32> to vector<1x128xf32>
    %3 = vector.shape_cast %2 : vector<1x128xf32> to vector<1x1x1x128xf32>
    %4 = arith.mulf %0, %0 : vector<1x8x8x128xf32>
    %cst_5 = arith.constant dense<0.000000e+00> : vector<1x128xf32>
    %5 = vector.multi_reduction <add>, %4, %cst_5 [1, 2] : vector<1x8x8x128xf32> to vector<1x128xf32>
    %6 = vector.shape_cast %5 : vector<1x128xf32> to vector<1x1x1x128xf32>
    %cst_6 = arith.constant 1.562500e-02 : f32
    %7 = vector.broadcast %cst_6 : f32 to vector<1x1x1x128xf32>
    %8 = arith.mulf %3, %7 : vector<1x1x1x128xf32>
    %9 = arith.mulf %3, %8 : vector<1x1x1x128xf32>
    %10 = arith.subf %6, %9 : vector<1x1x1x128xf32>
    %cst_7 = arith.constant 0.000000e+00 : f32
    %11 = vector.broadcast %cst_7 : f32 to vector<1x1x1x128xf32>
    %12 = arith.maximumf %10, %11 : vector<1x1x1x128xf32>
    %13 = vector.broadcast %8 : vector<1x1x1x128xf32> to vector<1x8x8x128xf32>
    %14 = arith.subf %0, %13 : vector<1x8x8x128xf32>
    %15 = arith.mulf %14, %14 : vector<1x8x8x128xf32>
    %cst_8 = arith.constant 0.0158730168 : f32
    %16 = vector.broadcast %cst_8 : f32 to vector<1x1x1x128xf32>
    %17 = arith.mulf %12, %16 : vector<1x1x1x128xf32>
    %18 = vector.broadcast %1 : f32 to vector<1x1x1x128xf32>
    %19 = arith.addf %17, %18 : vector<1x1x1x128xf32>
    %cst_9 = arith.constant 4.000000e+00 : f32
    %20 = vector.broadcast %cst_9 : f32 to vector<1x1x1x128xf32>
    %21 = arith.mulf %20, %19 : vector<1x1x1x128xf32>
    %22 = tpu.reciprocal %21 {approx = true} : vector<1x1x1x128xf32> -> vector<1x1x1x128xf32>
    %23 = vector.broadcast %22 : vector<1x1x1x128xf32> to vector<1x8x8x128xf32>
    %24 = arith.mulf %15, %23 : vector<1x8x8x128xf32>
    %cst_10 = arith.constant 5.000000e-01 : f32
    %25 = vector.broadcast %cst_10 : f32 to vector<1x8x8x128xf32>
    %26 = arith.addf %24, %25 : vector<1x8x8x128xf32>
    %27 = arith.negf %26 : vector<1x8x8x128xf32>
    %28 = math.exp %27 : vector<1x8x8x128xf32>
    %cst_11 = arith.constant 1.000000e+00 : f32
    %29 = vector.broadcast %cst_11 : f32 to vector<1x8x8x128xf32>
    %30 = arith.addf %29, %28 : vector<1x8x8x128xf32>
    %31 = arith.divf %29, %30 : vector<1x8x8x128xf32>
    %32 = arith.mulf %0, %31 : vector<1x8x8x128xf32>
    %cst_12 = arith.constant dense<0.000000e+00> : vector<1x128xf32>
    %33 = vector.multi_reduction <add>, %32, %cst_12 [1, 2] : vector<1x8x8x128xf32> to vector<1x128xf32>
    %cst_13 = arith.constant 1.562500e-02 : f32
    %34 = vector.broadcast %cst_13 : f32 to vector<1x128xf32>
    %35 = arith.mulf %33, %34 : vector<1x128xf32>
    %c0_14 = arith.constant 0 : index
    %c0_15 = arith.constant 0 : index
    %36 = vector.load %arg5[%c0_14, %c0_15] : memref<128x8xf32, #tpu.memory_space<vmem>>, vector<128x8xf32>
    %cst_16 = arith.constant dense<0.000000e+00> : vector<1x8xf32>
    %37 = tpu.matmul %35, %36, %cst_16 {dimension_numbers = #tpu.dot_dimension_numbers<[1], [0], [0], [1], [0, 0, 1, 1], [], []>} : vector<1x128xf32>, vector<128x8xf32>, vector<1x8xf32> -> vector<1x8xf32>
    %cst_17 = arith.constant 0.000000e+00 : f32
    %38 = vector.broadcast %cst_17 : f32 to vector<1x8xf32>
    %39 = arith.maximumf %37, %38 : vector<1x8xf32>
    %c0_18 = arith.constant 0 : index
    %c0_19 = arith.constant 0 : index
    %40 = vector.load %arg6[%c0_18, %c0_19] : memref<8x128xf32, #tpu.memory_space<vmem>>, vector<8x128xf32>
    %cst_20 = arith.constant dense<0.000000e+00> : vector<1x128xf32>
    %41 = tpu.matmul %39, %40, %cst_20 {dimension_numbers = #tpu.dot_dimension_numbers<[1], [0], [0], [1], [0, 0, 1, 1], [], []>} : vector<1x8xf32>, vector<8x128xf32>, vector<1x128xf32> -> vector<1x128xf32>
    %42 = arith.negf %41 : vector<1x128xf32>
    %43 = math.exp %42 : vector<1x128xf32>
    %cst_21 = arith.constant 1.000000e+00 : f32
    %44 = vector.broadcast %cst_21 : f32 to vector<1x128xf32>
    %45 = arith.addf %44, %43 : vector<1x128xf32>
    %46 = arith.divf %44, %45 : vector<1x128xf32>
    %47 = vector.shape_cast %46 : vector<1x128xf32> to vector<1x1x1x128xf32>
    %48 = vector.broadcast %47 : vector<1x1x1x128xf32> to vector<1x8x8x128xf32>
    %49 = arith.mulf %32, %48 : vector<1x8x8x128xf32>
    %c0_22 = arith.constant 0 : index
    %c0_23 = arith.constant 0 : index
    %c0_24 = arith.constant 0 : index
    %c0_25 = arith.constant 0 : index
    %50 = vector.load %arg7[%c0_22, %c0_23, %c0_24, %c0_25] : memref<1x8x8x128xf32, #tpu.memory_space<vmem>>, vector<1x8x8x128xf32>
    tpu.vector_store %arg7[%c0_22, %c0_23, %c0_24, %c0_25], %49 {strides = array<i32>} : memref<1x8x8x128xf32, #tpu.memory_space<vmem>>, vector<1x8x8x128xf32>,
    return
  }
  func.func @transform_0(%arg0: i32, %arg1: i32, %arg2: i32) -> (i32, i32) {
    %c0_i32 = arith.constant 0 : i32
    %c0_i32_0 = arith.constant 0 : i32
    %c0_i32_1 = arith.constant 0 : i32
    return %c0_i32, %c0_i32_0 : i32, i32
  }
  func.func @transform_1(%arg0: i32, %arg1: i32, %arg2: i32) -> (i32, i32, i32, i32) {
    %c0_i32 = arith.constant 0 : i32
    %c0_i32_0 = arith.constant 0 : i32
    return %arg0, %arg1, %arg2, %c0_i32 : i32, i32, i32, i32
  }
  func.func @transform_2(%arg0: i32, %arg1: i32, %arg2: i32) -> (i32, i32) {
    %c0_i32 = arith.constant 0 : i32
    %c0_i32_0 = arith.constant 0 : i32
    %c0_i32_1 = arith.constant 0 : i32
    return %c0_i32, %c0_i32_0 : i32, i32
  }
  func.func @transform_3(%arg0: i32, %arg1: i32, %arg2: i32) -> (i32, i32) {
    %c0_i32 = arith.constant 0 : i32
    %c0_i32_0 = arith.constant 0 : i32
    %c0_i32_1 = arith.constant 0 : i32
    return %c0_i32, %c0_i32_0 : i32, i32
  }
  func.func @transform_4(%arg0: i32, %arg1: i32, %arg2: i32) -> (i32, i32, i32, i32) {
    %c0_i32 = arith.constant 0 : i32
    %c0_i32_0 = arith.constant 0 : i32
    return %arg0, %arg1, %arg2, %c0_i32 : i32, i32, i32, i32
  }
}

</mosaic_0001>

<bundles_post_ra>
// kernel: dsws_conv2x2.2
= control target key start
LH: loop header
LB: loop body
LE: loop exit
PB: predicated region body
PF: predicated region fallthrough
CT: control target
= control target key end

     0   :  { %s1178_s12 = smov 0   ;;  %s1470_s0 = inlined_call_operand.vmem [shape: f32[512,4], index: 0, kind: input, shape index: {}]   ;;  %s1471_s1 = inlined_call_operand.vmem [shape: f32[4,128], index: 1, kind: input, shape index: {}]   ;;  %s1472_s2 = inlined_call_operand.vmem [shape: f32[1,128], index: 2, kind: input, shape index: {}]   ;;  %s1473_s3 = inlined_call_operand.vmem [shape: f32[512,128], index: 3, kind: output, shape index: {}]  }
   0x1 LB: > { %s852_s13 = sadd.s32 4294967295, %s1156_s12   ;;  %p856_p0 = scmp.ge.s32.totalorder %s1156_s12, 1  ;;  %s1156_s12 = sphi %s1178_s12, %s13_s12  }
   0x2   : > { %p138_p1 = scmp.lt.s32.totalorder %s1156_s12, 3 }
   0x4   : > { %p139_p2 = pnand %p856_p0, %p138_p1 }
   0x5   : > { %s857_s16 = sshll.u32 (!%p139_p2), %s852_s13, 5 }
   0x6   : > { %142 = sbr.rel (%p139_p2) target bundleno = 293 (0x125), region = 32  ;;  %p163_p3 = scmp.lt.s32.totalorder (!%p139_p2), %s857_s16, 63 }
   0xb   : > { %v206_v0 = vld [vmem:[%s1471_s1] sm:$0xf]  ;;  %vm311_vm0 = vcmask 1043456   ;;  %s1475_s16 = smov (!%p163_p3, %s857_s16), 63  ;;  %vm214_vm1 = vcmask 31744  }
   0xc   : > { %962 = vmatprep.subr.msk.mxu0 %vm311_vm0, %v206_v0  ;;  %1012 = vmatprep.subr.msk.mxu1 %vm311_vm0, %v206_v0  ;;  %s858_s17 = sshll.u32 %s1475_s16, 3  ;;  %v1266_v33 = vld [vmem:[%s1472_s2] ss:$0 sm:$0xff] }
   0xd   : > { %963 = vmatpush3.msk.msra.mxu0 %vm311_vm0, %v206_v0  ;;  %1013 = vmatpush3.msk.msra.mxu1 %vm311_vm0, %v206_v0  ;;  %s1197_s20 = scalar_lea.vmem %s1470_s0, %s858_s17  ;;  %s1353_s25 = scalar_lea.vmem %s1473_s3, %s858_s17 }
   0xe   : > { %v174_v1 = vld [vmem:[%s1197_s20] sm:$0xff]  ;;  %v175_v3 = vld [vmem:[%s1197_s20 + $0x8] sm:$0xff]  ;;  %v176_v5 = vld [vmem:[%s1197_s20 + $0x10] sm:$0xff] }
   0xf   : > { %v190_v2 = vld [vmem:[%s1197_s20 + $0x80] sm:$0xff]  ;;  %964 = vmatprep.mubr.msk.f32.mxu0 %vm214_vm1, %v174_v1  ;;  %v191_v4 = vld [vmem:[%s1197_s20 + $0x88] sm:$0xff]  ;;  %v192_v6 = vld [vmem:[%s1197_s20 + $0x90] sm:$0xff] }
  0x10   : > { %988 = vmatprep.mubr.msk.f32.mxu1 %vm214_vm1, %v190_v2  ;;  %965 = vmatmul.mubr.msk.f32.vlgmr.msra.gmra.mxu0 %vm214_vm1, %v175_v3  ;;  %v177_v7 = vld [vmem:[%s1197_s20 + $0x18] sm:$0xff]  ;;  %v178_v9 = vld [vmem:[%s1197_s20 + $0x20] sm:$0xff]  ;;  %v179_v11 = vld [vmem:[%s1197_s20 + $0x28] sm:$0xff] }
  0x11   : > { %989 = vmatmul.mubr.msk.f32.vlgmr.msra.gmra.mxu1 %vm214_vm1, %v191_v4  ;;  %967 = vmatprep.mubr.msk.f32.mxu0 %vm214_vm1, %v176_v5  ;;  %v193_v8 = vld [vmem:[%s1197_s20 + $0x98] sm:$0xff]  ;;  %v194_v10 = vld [vmem:[%s1197_s20 + $0xa0] sm:$0xff]  ;;  %v195_v12 = vld [vmem:[%s1197_s20 + $0xa8] sm:$0xff] }
  0x12   : > { %991 = vmatprep.mubr.msk.f32.mxu1 %vm214_vm1, %v192_v6  ;;  %v180_v13 = vld [vmem:[%s1197_s20 + $0x30] sm:$0xff]  ;;  %v181_v15 = vld [vmem:[%s1197_s20 + $0x38] sm:$0xff]  ;;  %v182_v17 = vld [vmem:[%s1197_s20 + $0x40] sm:$0xff] }
  0x13   : > { %v196_v14 = vld [vmem:[%s1197_s20 + $0xb0] sm:$0xff]  ;;  %v197_v16 = vld [vmem:[%s1197_s20 + $0xb8] sm:$0xff]  ;;  %v198_v18 = vld [vmem:[%s1197_s20 + $0xc0] sm:$0xff] }
  0x14   : > { %968 = vmatmul.mubr.msk.f32.gmra.mxu0 %vm214_vm1, %v177_v7  ;;  %v183_v19 = vld [vmem:[%s1197_s20 + $0x48] sm:$0xff]  ;;  %v184_v21 = vld [vmem:[%s1197_s20 + $0x50] sm:$0xff]  ;;  %v185_v23 = vld [vmem:[%s1197_s20 + $0x58] sm:$0xff] }
  0x15   : > { %992 = vmatmul.mubr.msk.f32.gmra.mxu1 %vm214_vm1, %v193_v8  ;;  %970 = vmatprep.mubr.msk.f32.mxu0 %vm214_vm1, %v178_v9  ;;  %v199_v20 = vld [vmem:[%s1197_s20 + $0xc8] sm:$0xff]  ;;  %v200_v22 = vld [vmem:[%s1197_s20 + $0xd0] sm:$0xff]  ;;  %v201_v24 = vld [vmem:[%s1197_s20 + $0xd8] sm:$0xff] }
  0x16   : > { %994 = vmatprep.mubr.msk.f32.mxu1 %vm214_vm1, %v194_v10  ;;  %v186_v25 = vld [vmem:[%s1197_s20 + $0x60] sm:$0xff]  ;;  %v187_v27 = vld [vmem:[%s1197_s20 + $0x68] sm:$0xff]  ;;  %v188_v29 = vld [vmem:[%s1197_s20 + $0x70] sm:$0xff] }
  0x17   : > { %v202_v26 = vld [vmem:[%s1197_s20 + $0xe0] sm:$0xff]  ;;  %v203_v28 = vld [vmem:[%s1197_s20 + $0xe8] sm:$0xff]  ;;  %v204_v30 = vld [vmem:[%s1197_s20 + $0xf0] sm:$0xff] }
  0x18   : > { %971 = vmatmul.mubr.msk.f32.gmra.mxu0 %vm214_vm1, %v179_v11  ;;  %v189_v31 = vld [vmem:[%s1197_s20 + $0x78] sm:$0xff] }
  0x19   : > { %995 = vmatmul.mubr.msk.f32.gmra.mxu1 %vm214_vm1, %v195_v12  ;;  %973 = vmatprep.mubr.msk.f32.mxu0 %vm214_vm1, %v180_v13  ;;  %v205_v32 = vld [vmem:[%s1197_s20 + $0xf8] sm:$0xff] }
  0x1a   : > { %997 = vmatprep.mubr.msk.f32.mxu1 %vm214_vm1, %v196_v14 }
  0x1c   : > { %974 = vmatmul.mubr.msk.f32.gmra.mxu0 %vm214_vm1, %v181_v15 }
  0x1d   : > { %998 = vmatmul.mubr.msk.f32.gmra.mxu1 %vm214_vm1, %v197_v16  ;;  %976 = vmatprep.mubr.msk.f32.mxu0 %vm214_vm1, %v182_v17 }
  0x1e   : > { %1000 = vmatprep.mubr.msk.f32.mxu1 %vm214_vm1, %v198_v18 }
  0x20   : > { %977 = vmatmul.mubr.msk.f32.gmra.mxu0 %vm214_vm1, %v183_v19 }
  0x21   : > { %1001 = vmatmul.mubr.msk.f32.gmra.mxu1 %vm214_vm1, %v199_v20  ;;  %979 = vmatprep.mubr.msk.f32.mxu0 %vm214_vm1, %v184_v21 }
  0x22   : > { %1003 = vmatprep.mubr.msk.f32.mxu1 %vm214_vm1, %v200_v22 }
  0x24   : > { %980 = vmatmul.mubr.msk.f32.gmra.mxu0 %vm214_vm1, %v185_v23 }
  0x25   : > { %1004 = vmatmul.mubr.msk.f32.gmra.mxu1 %vm214_vm1, %v201_v24  ;;  %982 = vmatprep.mubr.msk.f32.mxu0 %vm214_vm1, %v186_v25 }
  0x26   : > { %1006 = vmatprep.mubr.msk.f32.mxu1 %vm214_vm1, %v202_v26 }
  0x28   : > { %983 = vmatmul.mubr.msk.f32.gmra.mxu0 %vm214_vm1, %v187_v27 }
  0x29   : > { %1007 = vmatmul.mubr.msk.f32.gmra.mxu1 %vm214_vm1, %v203_v28  ;;  %985 = vmatprep.mubr.msk.f32.mxu0 %vm214_vm1, %v188_v29 }
  0x2a   : > { %1009 = vmatprep.mubr.msk.f32.mxu1 %vm214_vm1, %v204_v30 }
  0x2c   : > { %986 = vmatmul.mubr.msk.f32.gmra.mxu0 %vm214_vm1, %v189_v31 }
  0x2d   : > { %1010 = vmatmul.mubr.msk.f32.gmra.mxu1 %vm214_vm1, %v205_v32 }
  0xd0   : > { %v966_v34 = vpop.f32.mrf.mxu0 }
  0xd1   : > { %v990_v35 = vpop.f32.mrf.mxu1  ;;  %v1269_v36 = vadd.f32 %v966_v34, %v1266_v33 }
  0xd2   : > { %v1272_v37 = vadd.f32 %v990_v35, %v1266_v33  ;;  %v381_v38 = vpop.f32.mrf.mxu0 }
  0xd3   : > { %v461_v39 = vpop.f32.mrf.mxu1  ;;  %v896_v40 = vmul.f32 -1.442695, %v1269_v36  ;;  %v1277_v42 = vadd.f32 %v1266_v33, %v381_v38 }
  0xd4   : > { %v912_v41 = vmul.f32 -1.442695, %v1272_v37  ;;  %v1280_v43 = vadd.f32 %v1266_v33, %v461_v39  ;;  %v969_v44 = vpop.f32.mrf.mxu0 }
  0xd5   : > { %v993_v45 = vpop.f32.mrf.mxu1  ;;  %1022 = vpow2.f32 %v896_v40  ;;  %v895_v46 = vmul.f32 -1.442695, %v1277_v42  ;;  %v1285_v48 = vadd.f32 %v969_v44, %v1266_v33 }
  0xd6   : > { %v911_v47 = vmul.f32 -1.442695, %v1280_v43  ;;  %1024 = vpow2.f32 %v912_v41  ;;  %v1288_v49 = vadd.f32 %v993_v45, %v1266_v33  ;;  %v391_v50 = vpop.f32.mrf.mxu0 }
  0xd7   : > { %v471_v51 = vpop.f32.mrf.mxu1  ;;  %1026 = vpow2.f32 %v895_v46  ;;  %v898_v52 = vmul.f32 -1.442695, %v1285_v48  ;;  %v1292_v53 = vadd.f32 %v1266_v33, %v391_v50 }
  0xd8   : > { %v1295_v54 = vadd.f32 %v1266_v33, %v471_v51  ;;  %1028 = vpow2.f32 %v911_v47  ;;  %v914_v55 = vmul.f32 -1.442695, %v1288_v49  ;;  %v972_v56 = vpop.f32.mrf.mxu0 }
  0xd9   : > { %v996_v57 = vpop.f32.mrf.mxu1  ;;  %1030 = vpow2.f32 %v898_v52  ;;  %v897_v58 = vmul.f32 -1.442695, %v1292_v53  ;;  %v1301_v60 = vadd.f32 %v972_v56, %v1266_v33 }
  0xda   : > { %v913_v59 = vmul.f32 -1.442695, %v1295_v54  ;;  %1032 = vpow2.f32 %v914_v55  ;;  %v1304_v61 = vadd.f32 %v996_v57, %v1266_v33  ;;  %v401_v62 = vpop.f32.mrf.mxu0 }
  0xdb   : > { %v481_v63 = vpop.f32.mrf.mxu1  ;;  %1034 = vpow2.f32 %v897_v58  ;;  %v900_v0 = vmul.f32 -1.442695, %v1301_v60  ;;  %v1308_v1 = vadd.f32 %v1266_v33, %v401_v62 }
  0xdc   : > { %v1311_v2 = vadd.f32 %v1266_v33, %v481_v63  ;;  %1036 = vpow2.f32 %v913_v59  ;;  %v916_v3 = vmul.f32 -1.442695, %v1304_v61  ;;  %v975_v4 = vpop.f32.mrf.mxu0 }
  0xdd   : > { %v999_v5 = vpop.f32.mrf.mxu1  ;;  %1038 = vpow2.f32 %v900_v0  ;;  %v899_v6 = vmul.f32 -1.442695, %v1308_v1  ;;  %v1317_v8 = vadd.f32 %v975_v4, %v1266_v33 }
  0xde   : > { %v915_v7 = vmul.f32 -1.442695, %v1311_v2  ;;  %1040 = vpow2.f32 %v916_v3  ;;  %v1320_v9 = vadd.f32 %v999_v5, %v1266_v33  ;;  %v411_v10 = vpop.f32.mrf.mxu0 }
  0xdf   : > { %v491_v11 = vpop.f32.mrf.mxu1  ;;  %1042 = vpow2.f32 %v899_v6  ;;  %v902_v12 = vmul.f32 -1.442695, %v1317_v8  ;;  %v1324_v13 = vadd.f32 %v1266_v33, %v411_v10 }
  0xe0   : > { %v1327_v14 = vadd.f32 %v1266_v33, %v491_v11  ;;  %1044 = vpow2.f32 %v915_v7  ;;  %v918_v15 = vmul.f32 -1.442695, %v1320_v9  ;;  %v978_v16 = vpop.f32.mrf.mxu0 }
  0xe1   : > { %v1002_v17 = vpop.f32.mrf.mxu1  ;;  %1046 = vpow2.f32 %v902_v12  ;;  %v901_v18 = vmul.f32 -1.442695, %v1324_v13  ;;  %v1333_v59 = vadd.f32 %v978_v16, %v1266_v33 }
  0xe2   : > { %v917_v19 = vmul.f32 -1.442695, %v1327_v14  ;;  %v1023_v20 = vpop.eup %1022  ;;  %1048 = vpow2.f32 %v918_v15  ;;  %v421_v21 = vpop.f32.mrf.mxu0  ;;  %v1336_v3 = vadd.f32 %v1002_v17, %v1266_v33 }
  0xe3   : > { %v501_v22 = vpop.f32.mrf.mxu1  ;;  %v1025_v23 = vpop.eup %1024  ;;  %v637_v24 = vadd.f32 1.0, %v1023_v20  ;;  %1050 = vpow2.f32 %v901_v18  ;;  %v1339_v6 = vadd.f32 %v1266_v33, %v421_v21  ;;  %v904_v17 = vmul.f32 -1.442695, %v1333_v59 }
  0xe4   : > { %v1027_v25 = vpop.eup %1026  ;;  %v653_v26 = vadd.f32 1.0, %v1025_v23  ;;  %1052 = vpow2.f32 %v917_v19  ;;  %v981_v27 = vpop.f32.mrf.mxu0  ;;  %v1342_v11 = vadd.f32 %v1266_v33, %v501_v22  ;;  %v920_v22 = vmul.f32 -1.442695, %v1336_v3 }
  0xe5   : > { %v1029_v28 = vpop.eup %1028  ;;  %1054 = vrcp.f32 %v637_v24  ;;  %v636_v29 = vadd.f32 1.0, %v1027_v25  ;;  %v1005_v30 = vpop.f32.mrf.mxu1  ;;  %v1346_v18 = vadd.f32 %v981_v27, %v1266_v33 }
  0xe6   : > { %v1031_v31 = vpop.eup %1030  ;;  %1056 = vrcp.f32 %v653_v26  ;;  %v652_v32 = vadd.f32 1.0, %v1029_v28  ;;  %v431_v40 = vpop.f32.mrf.mxu0  ;;  %v1357_v23 = vadd.f32 %v1005_v30, %v1266_v33  ;;  %v903_v26 = vmul.f32 -1.442695, %v1339_v6 }
  0xe7   : > { %v1033_v34 = vpop.eup %1032  ;;  %1058 = vrcp.f32 %v636_v29  ;;  %v639_v35 = vadd.f32 1.0, %v1031_v31  ;;  %v511_v45 = vpop.f32.mrf.mxu1  ;;  %v1362_v27 = vadd.f32 %v1266_v33, %v431_v40  ;;  %v919_v31 = vmul.f32 -1.442695, %v1342_v11 }
  0xe8   : > { %v1035_v38 = vpop.eup %1034  ;;  %1060 = vrcp.f32 %v652_v32  ;;  %v655_v39 = vadd.f32 1.0, %v1033_v34  ;;  %v984_v56 = vpop.f32.mrf.mxu0  ;;  %v1367_v32 = vadd.f32 %v1266_v33, %v511_v45 }
  0xe9   : > { %v1037_v41 = vpop.eup %1036  ;;  %1062 = vrcp.f32 %v639_v35  ;;  %v638_v44 = vadd.f32 1.0, %v1035_v38  ;;  %v1008_v62 = vpop.f32.mrf.mxu1  ;;  %v906_v35 = vmul.f32 -1.442695, %v1346_v18  ;;  %v1373_v38 = vadd.f32 %v984_v56, %v1266_v33 }
  0xea   : > { %v1039_v46 = vpop.eup %1038  ;;  %1064 = vrcp.f32 %v655_v39  ;;  %v654_v47 = vadd.f32 1.0, %v1037_v41  ;;  %v441_v12 = vpop.f32.mrf.mxu0  ;;  %v922_v41 = vmul.f32 -1.442695, %v1357_v23 }
  0xeb   : > { %v1041_v50 = vpop.eup %1040  ;;  %1066 = vrcp.f32 %v638_v44  ;;  %v641_v51 = vadd.f32 1.0, %v1039_v46  ;;  %v521_v19 = vpop.f32.mrf.mxu1  ;;  %v1379_v44 = vadd.f32 %v1008_v62, %v1266_v33  ;;  %v905_v46 = vmul.f32 -1.442695, %v1362_v27 }
  0xec   : > { %v1043_v52 = vpop.eup %1042  ;;  %1068 = vrcp.f32 %v654_v47  ;;  %v657_v55 = vadd.f32 1.0, %v1041_v50  ;;  %v987_v30 = vpop.f32.mrf.mxu0  ;;  %v1385_v47 = vadd.f32 %v1266_v33, %v441_v12 }
  0xed   : > { %v1045_v57 = vpop.eup %1044  ;;  %1070 = vrcp.f32 %v641_v51  ;;  %v640_v58 = vadd.f32 1.0, %v1043_v52  ;;  %v921_v51 = vmul.f32 -1.442695, %v1367_v32  ;;  %v1391_v52 = vadd.f32 %v1266_v33, %v521_v19 }
  0xee   : > { %v1047_v63 = vpop.eup %1046  ;;  %1072 = vrcp.f32 %v657_v55  ;;  %v656_v0 = vadd.f32 1.0, %v1045_v57  ;;  %v451_v55 = vpop.f32.mrf.mxu0  ;;  %v908_v57 = vmul.f32 -1.442695, %v1373_v38 }
  0xef   : > { %v1049_v4 = vpop.eup %1048  ;;  %1074 = vrcp.f32 %v640_v58  ;;  %v643_v5 = vadd.f32 1.0, %v1047_v63  ;;  %v1397_v58 = vadd.f32 %v987_v30, %v1266_v33 }
  0xf0   : > { %v1051_v7 = vpop.eup %1050  ;;  %1076 = vrcp.f32 %v656_v0  ;;  %v659_v10 = vadd.f32 1.0, %v1049_v4  ;;  %v924_v0 = vmul.f32 -1.442695, %v1379_v44 }
  0xf1   : > { %v1053_v15 = vpop.eup %1052  ;;  %1078 = vrcp.f32 %v643_v5  ;;  %v642_v16 = vadd.f32 1.0, %v1051_v7  ;;  %v907_v7 = vmul.f32 -1.442695, %v1385_v47  ;;  %v910_v19 = vmul.f32 -1.442695, %v1397_v58 }
  0xf2   : > { %v1055_v20 = vpop.eup %1054  ;;  %1080 = vrcp.f32 %v659_v10  ;;  %v658_v21 = vadd.f32 1.0, %v1053_v15  ;;  %v1409_v10 = vadd.f32 %v1266_v33, %v451_v55  ;;  %v923_v15 = vmul.f32 -1.442695, %v1391_v52 }
  0xf3   : > { %v1057_v24 = vpop.eup %1056  ;;  %v733_v25 = vmul.f32 %v1055_v20, %v1269_v36  ;;  %1082 = vrcp.f32 %v642_v16 }
  0xf4   : > { %v1059_v28 = vpop.eup %1058  ;;  %v749_v29 = vmul.f32 %v1057_v24, %v1272_v37  ;;  %1084 = vrcp.f32 %v658_v21  ;;  %v1011_v37 = vpop.f32.mrf.mxu1 }
  0xf5   : > { %v1061_v34 = vpop.eup %1060  ;;  %765 = vst [vmem:[%s1353_s25 + $0x8] sm:$0xff] %v733_v25  ;;  %v732_v36 = vmul.f32 %v1059_v28, %v1277_v42  ;;  %1086 = vpow2.f32 %v904_v17  ;;  %v1403_v4 = vadd.f32 %v1011_v37, %v1266_v33 }
  0xf6   : > { %v1063_v39 = vpop.eup %1062  ;;  %781 = vst [vmem:[%s1353_s25 + $0x88] sm:$0xff] %v749_v29  ;;  %v748_v40 = vmul.f32 %v1061_v34, %v1280_v43  ;;  %1088 = vpow2.f32 %v920_v22 }
  0xf7   : > { %v1065_v42 = vpop.eup %1064  ;;  %764 = vst [vmem:[%s1353_s25] sm:$0xff] %v732_v36  ;;  %v735_v45 = vmul.f32 %v1063_v39, %v1285_v48  ;;  %1090 = vpow2.f32 %v903_v26 }
  0xf8   : > { %v1067_v50 = vpop.eup %1066  ;;  %780 = vst [vmem:[%s1353_s25 + $0x80] sm:$0xff] %v748_v40  ;;  %v751_v43 = vmul.f32 %v1065_v42, %v1288_v49  ;;  %1092 = vpow2.f32 %v919_v31  ;;  %v531_v49 = vpop.f32.mrf.mxu1 }
  0xf9   : > { %v1069_v48 = vpop.eup %1068  ;;  %767 = vst [vmem:[%s1353_s25 + $0x18] sm:$0xff] %v735_v45  ;;  %v734_v56 = vmul.f32 %v1067_v50, %v1292_v53  ;;  %1094 = vpow2.f32 %v906_v35  ;;  %v1415_v16 = vadd.f32 %v1266_v33, %v531_v49 }
  0xfa   : > { %v1071_v62 = vpop.eup %1070  ;;  %783 = vst [vmem:[%s1353_s25 + $0x98] sm:$0xff] %v751_v43  ;;  %v750_v63 = vmul.f32 %v1069_v48, %v1295_v54  ;;  %1096 = vpow2.f32 %v922_v41 }
  0xfb   : > { %v1073_v53 = vpop.eup %1072  ;;  %766 = vst [vmem:[%s1353_s25 + $0x10] sm:$0xff] %v734_v56  ;;  %v737_v5 = vmul.f32 %v1071_v62, %v1301_v60  ;;  %1098 = vpow2.f32 %v905_v46 }
  0xfc   : > { %v1075_v12 = vpop.eup %1074  ;;  %782 = vst [vmem:[%s1353_s25 + $0x90] sm:$0xff] %v750_v63  ;;  %v753_v54 = vmul.f32 %v1073_v53, %v1304_v61  ;;  %1100 = vpow2.f32 %v921_v51  ;;  %v926_v61 = vmul.f32 -1.442695, %v1403_v4 }
  0xfd   : > { %v1077_v17 = vpop.eup %1076  ;;  %769 = vst [vmem:[%s1353_s25 + $0x28] sm:$0xff] %v737_v5  ;;  %v736_v60 = vmul.f32 %v1075_v12, %v1308_v1  ;;  %1102 = vpow2.f32 %v908_v57  ;;  %v909_v1 = vmul.f32 -1.442695, %v1409_v10 }
  0xfe   : > { %v1079_v20 = vpop.eup %1078  ;;  %785 = vst [vmem:[%s1353_s25 + $0xa8] sm:$0xff] %v753_v54  ;;  %v752_v21 = vmul.f32 %v1077_v17, %v1311_v2  ;;  %1104 = vpow2.f32 %v924_v0  ;;  %v925_v2 = vmul.f32 -1.442695, %v1415_v16 }
  0xff   : > { %v1081_v22 = vpop.eup %1080  ;;  %768 = vst [vmem:[%s1353_s25 + $0x20] sm:$0xff] %v736_v60  ;;  %v739_v33 = vmul.f32 %v1079_v20, %v1317_v8  ;;  %1106 = vpow2.f32 %v907_v7 }
 0x100   : > { %v1083_v24 = vpop.eup %1082  ;;  %784 = vst [vmem:[%s1353_s25 + $0xa0] sm:$0xff] %v752_v21  ;;  %v755_v25 = vmul.f32 %v1081_v22, %v1320_v9  ;;  %1108 = vpow2.f32 %v923_v15 }
 0x101   : > { %v1085_v26 = vpop.eup %1084  ;;  %771 = vst [vmem:[%s1353_s25 + $0x38] sm:$0xff] %v739_v33  ;;  %v738_v28 = vmul.f32 %v1083_v24, %v1324_v13  ;;  %1110 = vpow2.f32 %v910_v19 }
 0x102   : > { %v1087_v29 = vpop.eup %1086  ;;  %787 = vst [vmem:[%s1353_s25 + $0xb8] sm:$0xff] %v755_v25  ;;  %v754_v8 = vmul.f32 %v1085_v26, %v1327_v14  ;;  %1112 = vpow2.f32 %v926_v61 }
 0x103   : > { %v1089_v31 = vpop.eup %1088  ;;  %770 = vst [vmem:[%s1353_s25 + $0x30] sm:$0xff] %v738_v28  ;;  %v645_v30 = vadd.f32 1.0, %v1087_v29  ;;  %1114 = vpow2.f32 %v909_v1 }
 0x104   : > { %v1091_v34 = vpop.eup %1090  ;;  %786 = vst [vmem:[%s1353_s25 + $0xb0] sm:$0xff] %v754_v8  ;;  %v661_v9 = vadd.f32 1.0, %v1089_v31  ;;  %1116 = vpow2.f32 %v925_v2 }
 0x105   : > { %v1093_v36 = vpop.eup %1092  ;;  %1118 = vrcp.f32 %v645_v30  ;;  %v644_v35 = vadd.f32 1.0, %v1091_v34 }
 0x106   : > { %v1095_v37 = vpop.eup %1094  ;;  %1120 = vrcp.f32 %v661_v9  ;;  %v660_v13 = vadd.f32 1.0, %v1093_v36 }
 0x107   : > { %v1097_v39 = vpop.eup %1096  ;;  %1122 = vrcp.f32 %v644_v35  ;;  %v647_v40 = vadd.f32 1.0, %v1095_v37 }
 0x108   : > { %v1099_v41 = vpop.eup %1098  ;;  %1124 = vrcp.f32 %v660_v13  ;;  %v663_v14 = vadd.f32 1.0, %v1097_v39 }
 0x109   : > { %v1101_v42 = vpop.eup %1100  ;;  %1126 = vrcp.f32 %v647_v40  ;;  %v646_v45 = vadd.f32 1.0, %v1099_v41 }
 0x10a   : > { %v1103_v46 = vpop.eup %1102  ;;  %1128 = vrcp.f32 %v663_v14  ;;  %v662_v50 = vadd.f32 1.0, %v1101_v42 }
 0x10b   : > { %v1105_v43 = vpop.eup %1104  ;;  %1130 = vrcp.f32 %v646_v45  ;;  %v649_v51 = vadd.f32 1.0, %v1103_v46 }
 0x10c   : > { %v1107_v55 = vpop.eup %1106  ;;  %1132 = vrcp.f32 %v662_v50  ;;  %v665_v48 = vadd.f32 1.0, %v1105_v43 }
 0x10d   : > { %v1109_v56 = vpop.eup %1108  ;;  %1134 = vrcp.f32 %v649_v51  ;;  %v648_v57 = vadd.f32 1.0, %v1107_v55 }
 0x10e   : > { %v1111_v49 = vpop.eup %1110  ;;  %1136 = vrcp.f32 %v665_v48  ;;  %v664_v62 = vadd.f32 1.0, %v1109_v56 }
 0x10f   : > { %v1113_v63 = vpop.eup %1112  ;;  %1138 = vrcp.f32 %v648_v57  ;;  %v651_v0 = vadd.f32 1.0, %v1111_v49 }
 0x110   : > { %v1115_v53 = vpop.eup %1114  ;;  %1140 = vrcp.f32 %v664_v62  ;;  %v667_v5 = vadd.f32 1.0, %v1113_v63 }
 0x111   : > { %v1117_v7 = vpop.eup %1116  ;;  %1142 = vrcp.f32 %v651_v0  ;;  %v650_v12 = vadd.f32 1.0, %v1115_v53 }
 0x112   : > { %v1119_v54 = vpop.eup %1118  ;;  %1144 = vrcp.f32 %v667_v5  ;;  %v666_v15 = vadd.f32 1.0, %v1117_v7 }
 0x113   : > { %v1121_v17 = vpop.eup %1120  ;;  %v741_v60 = vmul.f32 %v1119_v54, %v1333_v59  ;;  %1146 = vrcp.f32 %v650_v12 }
 0x114   : > { %v1123_v19 = vpop.eup %1122  ;;  %v757_v20 = vmul.f32 %v1121_v17, %v1336_v3  ;;  %1148 = vrcp.f32 %v666_v15 }
 0x115   : > { %v1125_v21 = vpop.eup %1124  ;;  %773 = vst [vmem:[%s1353_s25 + $0x48] sm:$0xff] %v741_v60  ;;  %v740_v61 = vmul.f32 %v1123_v19, %v1339_v6 }
 0x116   : > { %v1127_v22 = vpop.eup %1126  ;;  %789 = vst [vmem:[%s1353_s25 + $0xc8] sm:$0xff] %v757_v20  ;;  %v756_v33 = vmul.f32 %v1125_v21, %v1342_v11 }
 0x117   : > { %v1129_v1 = vpop.eup %1128  ;;  %772 = vst [vmem:[%s1353_s25 + $0x40] sm:$0xff] %v740_v61  ;;  %v743_v59 = vmul.f32 %v1127_v22, %v1346_v18 }
 0x118   : > { %v1131_v24 = vpop.eup %1130  ;;  %788 = vst [vmem:[%s1353_s25 + $0xc0] sm:$0xff] %v756_v33  ;;  %v759_v3 = vmul.f32 %v1129_v1, %v1357_v23 }
 0x119   : > { %v1133_v25 = vpop.eup %1132  ;;  %775 = vst [vmem:[%s1353_s25 + $0x58] sm:$0xff] %v743_v59  ;;  %v742_v6 = vmul.f32 %v1131_v24, %v1362_v27 }
 0x11a   : > { %v1135_v2 = vpop.eup %1134  ;;  %791 = vst [vmem:[%s1353_s25 + $0xd8] sm:$0xff] %v759_v3  ;;  %v758_v11 = vmul.f32 %v1133_v25, %v1367_v32 }
 0x11b   : > { %v1137_v26 = vpop.eup %1136  ;;  %774 = vst [vmem:[%s1353_s25 + $0x50] sm:$0xff] %v742_v6  ;;  %v745_v18 = vmul.f32 %v1135_v2, %v1373_v38 }
 0x11c   : > { %v1139_v28 = vpop.eup %1138  ;;  %790 = vst [vmem:[%s1353_s25 + $0xd0] sm:$0xff] %v758_v11  ;;  %v761_v23 = vmul.f32 %v1137_v26, %v1379_v44 }
 0x11d   : > { %v1141_v29 = vpop.eup %1140  ;;  %777 = vst [vmem:[%s1353_s25 + $0x68] sm:$0xff] %v745_v18  ;;  %v744_v27 = vmul.f32 %v1139_v28, %v1385_v47 }
 0x11e   : > { %v1143_v8 = vpop.eup %1142  ;;  %793 = vst [vmem:[%s1353_s25 + $0xe8] sm:$0xff] %v761_v23  ;;  %v760_v32 = vmul.f32 %v1141_v29, %v1391_v52 }
 0x11f   : > { %v1145_v31 = vpop.eup %1144  ;;  %776 = vst [vmem:[%s1353_s25 + $0x60] sm:$0xff] %v744_v27  ;;  %v747_v38 = vmul.f32 %v1143_v8, %v1397_v58 }
 0x120   : > { %v1147_v30 = vpop.eup %1146  ;;  %792 = vst [vmem:[%s1353_s25 + $0xe0] sm:$0xff] %v760_v32  ;;  %v763_v34 = vmul.f32 %v1145_v31, %v1403_v4 }
 0x121   : > { %v1149_v44 = vpop.eup %1148  ;;  %779 = vst [vmem:[%s1353_s25 + $0x78] sm:$0xff] %v747_v38  ;;  %v746_v9 = vmul.f32 %v1147_v30, %v1409_v10 }
 0x122   : > { %795 = vst [vmem:[%s1353_s25 + $0xf8] sm:$0xff] %v763_v34  ;;  %v762_v47 = vmul.f32 %v1149_v44, %v1415_v16 }
 0x123   : > { %778 = vst [vmem:[%s1353_s25 + $0x70] sm:$0xff] %v746_v9 }
 0x124   : > { %794 = vst [vmem:[%s1353_s25 + $0xf0] sm:$0xff] %v762_v47 }
 0x125 PF: > { %s13_s12 = sadd.s32 1, %s1156_s12  }
 0x126   : > { %p10_p4 = scmp.ge.s32.totalorder %s13_s12, 4  }
 0x128   :  { %12 = sbr.rel (!%p10_p4) target bundleno = 1 (0x1), region = 62 }

// kernel: dsws_conv2x2.3
= control target key start
LH: loop header
LB: loop body
LE: loop exit
PB: predicated region body
PF: predicated region fallthrough
CT: control target
= control target key end

     0   :  { %s1425_s0 = inlined_call_operand.<no memory space> [shape: f32[1,1], index: 0, kind: input, shape index: {}]   ;;  %s1426_s1 = inlined_call_operand.vmem [shape: f32[2,16,16,128], index: 1, kind: input, shape index: {}]   ;;  %s1427_s2 = inlined_call_operand.vmem [shape: f32[128,8], index: 2, kind: input, shape index: {}]   ;;  %s1428_s3 = inlined_call_operand.vmem [shape: f32[8,128], index: 3, kind: input, shape index: {}]   ;;  %s1429_s4 = inlined_call_operand.hbm [shape: f32[2,16,16,128], index: 4, kind: output, shape index: {}]  }
   0x1   :  { %9 = sst [smem:[#allocation2]] %s1425_s0 }
   0x2   :  { %10 = vsyncpa [#allocation5], 0 }
   0x3   :  { %12 = vsyncpa [#allocation5 + $0x1], 0  ;;  %s1111_s17 = smov 0   ;;  %s1113_s18 = smov 0  }
   0x4   :  { %s1115_s19 = smov 0   ;;  %s1117_s20 = smov 0  }
   0x5   :  { %s1119_s21 = smov 0   ;;  %s1121_s22 = smov 0  }
   0x6   :  { %s1123_s23 = smov 0   ;;  %s1125_s24 = smov 0  }
   0x7   :  { %s1127_s25 = smov 0   ;;  %s1129_s0 = smov 0  }
   0x8 LB: > { %s30_s26 = sadd.s32 1, %s1063_s23  ;;  %s33_s27 = sadd.s32 1, %s1067_s24  ;;  %s1075_s0 = sphi %s1129_s0, %s18_s0   ;;  %s1071_s25 = sphi %s1127_s25, %s1443_s25   ;;  %s1067_s24 = sphi %s1125_s24, %s1442_s24   ;;  %s1063_s23 = sphi %s1123_s23, %s1441_s23   ;;  %s1059_s22 = sphi %s1121_s22, %s1440_s22   ;;  %s1055_s21 = sphi %s1119_s21, %s1439_s21   ;;  %s1051_s20 = sphi %s1117_s20, %s1438_s20   ;;  %s1047_s19 = sphi %s1115_s19, %s1437_s19   ;;  %s1043_s18 = sphi %s1113_s18, %s1436_s18   ;;  %s1039_s17 = sphi %s1111_s17, %s1435_s17  }
   0x9   : > { %p31_p0 = scmp.ge.s32.totalorder %s30_s26, 2  ;;  %s747_s28 = sadd.s32 4294967295, %s1075_s0  }
   0xa   : > { %p76_p1 = scmp.ne.s32.totalorder %s1047_s19, %s1043_s18  ;;  %s37_s29 = sadd.s32 1, %s1071_s25 }
   0xb   : > { %s1445_s26 = smov (%p31_p0, %s30_s26), 0  ;;  %s1447_s27 = smov (!%p31_p0, %s33_s27), %s1067_s24 }
   0xc   : > { %p77_p2 = scmp.eq.s32.totalorder %s1075_s0, 0  ;;  %p35_p3 = scmp.ge.s32.totalorder %s1447_s27, 2 }
   0xd   : > { %p152_p4 = scmp.eq.s32.totalorder %s747_s28, 7  ;;  %s748_s30 = sadd.s32 4294967294, %s1075_s0  }
   0xe   : > { %p1172_p5 = por %p77_p2, %p76_p1  ;;  %s1449_s27 = smov (%p35_p3, %s1447_s27), 0 }
   0xf   : > { %s1451_s29 = smov (!%p35_p3, %s37_s29), %s1071_s25  ;;  %p1179_p6 = por %p152_p4, %p76_p1 }
  0x10   : > { %p157_p7 = scmp.ne.s32.totalorder %s1043_s18, %s1039_s17  ;;  %p39_p8 = scmp.ge.s32.totalorder %s1451_s29, 2 }
  0x11   : > { %p158_p9 = scmp.eq.s32.totalorder %s748_s30, 7  ;;  %s63_s7 = ssub.s32 %s1067_s24, %s1449_s27 }
  0x12   : > { %s1453_s29 = smov (%p39_p8, %s1451_s29), 0  ;;  %s65_s8 = ssub.s32 %s1063_s23, %s1445_s26 }
  0x13   : > { %p1191_p10 = por %p158_p9, %p157_p7  ;;  %s62_s10 = ssub.s32 %s1071_s25, %s1453_s29 }
  0x14   : > { %s64_s11 = sor.u32 %s63_s7, %s62_s10  ;;  %s69_s13 = sadd.s32 1, %s1047_s19 }
  0x15   : > { %s66_s12 = sor.u32 %s65_s8, %s64_s11  ;;  %p750_p12 = scmp.ge.s32.totalorder %s1075_s0, 8 }
  0x16   : > { %p67_p11 = scmp.eq.s32.totalorder %s66_s12, 0 }
  0x17   : > { %183 = sbr.rel (%p750_p12) target bundleno = 39 (0x27), region = 28 }
  0x18   : > { %s1199_s14 = scalar_select %p67_p11, %s1047_s19, %s69_s13  }
  0x1c   : > { %186 = sbr.rel (!%p1172_p5) target bundleno = 39 (0x27), region = 32  ;;  %s188_s15 = sand.u32 (%p1172_p5), 1, %s1047_s19  }
  0x1d   : > { %s776_s16 = sshll.u32 (%p1172_p5), %s1067_s24, 4  ;;  %s751_s28 = sshll.u32 (%p1172_p5), %s188_s15, 6 }
  0x1e   : > { %s193_s30 = sadd.s32 (%p1172_p5), %s1063_s23, %s776_s16  ;;  %s754_s7 = sshll.u32 (%p1172_p5), %s1071_s25, 5 }
  0x1f   : > { %s195_s8 = sadd.s32 (%p1172_p5), %s754_s7, %s193_s30  ;;  %s190_s5 = scalar_lea.vmem (%p1172_p5), [#allocation3], %s751_s28 }
  0x20   : > { %s755_s10 = sshll.u32 (%p1172_p5), %s195_s8, 3 }
  0x21   : > { %s197_s13 = scalar_lea.vmem %s1426_s1, %s755_s10 }
  0x22   : > { %v240_v0 = vld [vmem:[%s197_s13] sm:$0xff]  ;;  %v242_v1 = vld [vmem:[%s197_s13 + $0x10] sm:$0xff] }
  0x23   : > { %v244_v2 = vld [vmem:[%s197_s13 + $0x20] sm:$0xff]  ;;  %241 = vst [vmem:[%s190_s5] sm:$0xff] %v240_v0  ;;  %243 = vst [vmem:[%s190_s5 + $0x8] sm:$0xff] %v242_v1  ;;  %v246_v3 = vld [vmem:[%s197_s13 + $0x30] sm:$0xff] }
  0x24   : > { %245 = vst [vmem:[%s190_s5 + $0x10] sm:$0xff] %v244_v2  ;;  %v248_v4 = vld [vmem:[%s197_s13 + $0x40] sm:$0xff]  ;;  %v250_v5 = vld [vmem:[%s197_s13 + $0x50] sm:$0xff]  ;;  %247 = vst [vmem:[%s190_s5 + $0x18] sm:$0xff] %v246_v3 }
  0x25   : > { %249 = vst [vmem:[%s190_s5 + $0x20] sm:$0xff] %v248_v4  ;;  %251 = vst [vmem:[%s190_s5 + $0x28] sm:$0xff] %v250_v5  ;;  %v252_v6 = vld [vmem:[%s197_s13 + $0x60] sm:$0xff]  ;;  %v254_v7 = vld [vmem:[%s197_s13 + $0x70] sm:$0xff] }
  0x26   : > { %253 = vst [vmem:[%s190_s5 + $0x30] sm:$0xff] %v252_v6  ;;  %255 = vst [vmem:[%s190_s5 + $0x38] sm:$0xff] %v254_v7 }
  0x27 PF: > { %p756_p13 = scmp.ge.s32.totalorder %s1075_s0, 1  ;;  %p260_p0 = scmp.lt.s32.totalorder %s1075_s0, 9 }
  0x29   : > { %p261_p1 = pnand %p756_p13, %p260_p0 }
  0x2a   : > { %s1430_s28 = sand.u32 (!%p261_p1), 1, %s1043_s18   ;;  %s302_s12 = sld [smem:[#allocation2]] (!%p261_p1) }
  0x2b   : > { %264 = sbr.rel (%p261_p1) target bundleno = 614 (0x266), region = 70  ;;  %s1224_s8 = sshll.u32 (!%p261_p1), %s1430_s28, 6 }
  0x2c   : > { %s1237_s5 = scalar_lea.vmem (!%p261_p1), [#allocation3], %s1224_s8  ;;  %s777_s16 = sshll.u32 (!%p261_p1), %s1055_s21, 4 }
  0x2d   : > { %s649_s30 = sadd.s32 (!%p261_p1), %s1051_s20, %s777_s16  ;;  %s772_s7 = sshll.u32 (!%p261_p1), %s1059_s22, 5 }
  0x2e   : > { %s291_s11 = scalar_lea.vmem (!%p261_p1), [#allocation4], %s1224_s8  ;;  %s1434_s20 = sand.u32 (!%p261_p1), 1, %s1043_s18  }
  0x2f   : > { %s1368_s21 = scalar_lea.sflag (!%p261_p1), [#allocation5], %s1434_s20  ;;  %s1079_s8 = smov (!%p261_p1), [#allocation4]  }
  0x30   : > { %v463_v8 = vld [vmem:[%s1427_s2 + $0x78] sm:$0xff]  ;;  %v1077_v9 = vmov 0.0   ;;  %v462_v10 = vld [vmem:[%s1427_s2 + $0x70] sm:$0xff]  ;;  %vm1078_vm0 = vmmov 0   ;;  %v461_v11 = vld [vmem:[%s1427_s2 + $0x68] sm:$0xff]  ;;  %v358_v7 = vstv %s302_s12  ;;  %vm536_vm1 = vcmask 64512  }
  0x31   : > { %797 = vmatprep.subr.mxu0 %v1077_v9  ;;  %829 = vmatprep.mubr.msk.f32.mxu0 %vm1078_vm0, %v1077_v9  ;;  %v460_v12 = vld [vmem:[%s1427_s2 + $0x60] sm:$0xff]  ;;  %v1243_v14 = vld [vmem:[%s1237_s5 + $0x8] sm:$0xff]  ;;  %v1246_v15 = vld [vmem:[%s1237_s5 + $0x10] sm:$0xff]  ;;  %s654_s12 = sshll.u32 %s291_s11, 4  ;;  %s971_s16 = sshll.u32 %s1079_s8, 4  ;;  %s1364_s12 = int_to_ptr.vmem [resolvable:$true] %s654_s12  ;;  %s972_s16 = int_to_ptr.vmem [resolvable:$false] %s971_s16 }
  0x32   : > { %798 = vmatpush3.msra.mxu0 %v463_v8  ;;  %832 = vmatprep.subr.mxu1 %v1077_v9  ;;  %v1240_v13 = vld [vmem:[%s1237_s5] sm:$0xff]  ;;  %v317_v18 = vmul.f32 %v1243_v14, %v1243_v14  ;;  %v459_v19 = vld [vmem:[%s1427_s2 + $0x58] sm:$0xff]  ;;  %v318_v21 = vmul.f32 %v1246_v15, %v1246_v15  ;;  %v458_v23 = vld [vmem:[%s1427_s2 + $0x50] sm:$0xff]  ;;  %s967_s22 = scalar_lea.vmem %s1364_s12, 1024  ;;  %p974_p5 = scmp.lt.s32.totalorder %s1364_s12, %s972_s16 }
  0x33   : > { %799 = vmatprep.subr.mxu0 %v1077_v9  ;;  %834 = vmatprep.mubr.msk.f32.mxu1 %vm1078_vm0, %v1077_v9  ;;  %v303_v16 = vadd.f32 %v1243_v14, %v1240_v13  ;;  %v316_v17 = vmul.f32 %v1240_v13, %v1240_v13  ;;  %v1259_v20 = vld [vmem:[%s1237_s5 + $0x18] sm:$0xff]  ;;  %v1269_v24 = vld [vmem:[%s1237_s5 + $0x20] sm:$0xff]  ;;  %v457_v28 = vld [vmem:[%s1427_s2 + $0x48] sm:$0xff]  ;;  %p968_p2 = scmp.ne.s32.totalorder %s1364_s12, %s967_s22 }
  0x34   : > { %800 = vmatpush3.msra.mxu0 %v462_v10  ;;  %v319_v25 = vmul.f32 %v1259_v20, %v1259_v20  ;;  %v1279_v29 = vld [vmem:[%s1237_s5 + $0x28] sm:$0xff]  ;;  %v320_v30 = vmul.f32 %v1269_v24, %v1269_v24  ;;  %v456_v33 = vld [vmem:[%s1427_s2 + $0x40] sm:$0xff]  ;;  %v1289_v34 = vld [vmem:[%s1237_s5 + $0x30] sm:$0xff] }
  0x35   : > { %801 = vmatprep.subr.mxu0 %v1077_v9  ;;  %v304_v22 = vadd.f32 %v303_v16, %v1246_v15  ;;  %v324_v26 = vadd.f32 %v317_v18, %v316_v17  ;;  %v321_v35 = vmul.f32 %v1279_v29, %v1279_v29  ;;  %v455_v38 = vld [vmem:[%s1427_s2 + $0x38] sm:$0xff]  ;;  %v322_v40 = vmul.f32 %v1289_v34, %v1289_v34  ;;  %v454_v43 = vld [vmem:[%s1427_s2 + $0x30] sm:$0xff]  ;;  %v453_v47 = vld [vmem:[%s1427_s2 + $0x28] sm:$0xff]  ;;  %p969_p3 = pnand %p968_p2, %p1179_p6 }
  0x36   : > { %802 = vmatpush3.msra.mxu0 %v461_v11  ;;  %v1299_v39 = vld [vmem:[%s1237_s5 + $0x38] sm:$0xff]  ;;  %v452_v50 = vld [vmem:[%s1427_s2 + $0x20] sm:$0xff]  ;;  %v450_v56 = vld [vmem:[%s1427_s2 + $0x10] sm:$0xff]  ;;  %s651_s5 = sadd.s32 %s772_s7, %s649_s30  ;;  %s973_s30 = scalar_lea.vmem %s972_s16, 2048 }
  0x37   : > { %803 = vmatprep.subr.mxu0 %v1077_v9  ;;  %v305_v27 = vadd.f32 %v304_v22, %v1259_v20  ;;  %v325_v31 = vadd.f32 %v324_v26, %v318_v21  ;;  %v323_v44 = vmul.f32 %v1299_v39, %v1299_v39  ;;  %v451_v53 = vld [vmem:[%s1427_s2 + $0x18] sm:$0xff]  ;;  %v449_v59 = vld [vmem:[%s1427_s2 + $0x8] sm:$0xff]  ;;  %v448_v62 = vld [vmem:[%s1427_s2] sm:$0xff]  ;;  %s773_s10 = sshll.u32 %s651_s5, 7  ;;  %p970_p4 = pneg %p969_p3 }
  0x38   : > { %804 = vmatpush3.msra.mxu0 %v460_v12  ;;  %s1362_s28 = scalar_lea.hbm %s1429_s4, %s773_s10  ;;  %p975_p7 = scmp.lt.s32.totalorder %s973_s30, %s967_s22 }
  0x39   : > { %805 = vmatprep.subr.mxu0 %v1077_v9  ;;  %v306_v32 = vadd.f32 %v305_v27, %v1269_v24  ;;  %v326_v36 = vadd.f32 %v325_v31, %v319_v25 }
  0x3a   : > { %806 = vmatpush3.msra.mxu0 %v459_v19  ;;  %p976_p8 = por %p975_p7, %p974_p5 }
  0x3b   : > { %807 = vmatprep.subr.mxu0 %v1077_v9  ;;  %v307_v37 = vadd.f32 %v306_v32, %v1279_v29  ;;  %v327_v41 = vadd.f32 %v326_v36, %v320_v30 }
  0x3c   : > { %808 = vmatpush3.msra.mxu0 %v458_v23  ;;  %p977_p9 = pnand %p976_p8, %p970_p4 }
  0x3d   : > { %809 = vmatprep.subr.mxu0 %v1077_v9  ;;  %v308_v42 = vadd.f32 %v307_v37, %v1289_v34  ;;  %v328_v45 = vadd.f32 %v327_v41, %v321_v35 }
  0x3e   : > { %810 = vmatpush3.msra.mxu0 %v457_v28 }
  0x3f   : > { %811 = vmatprep.subr.mxu0 %v1077_v9  ;;  %v309_v46 = vadd.f32 %v308_v42, %v1299_v39  ;;  %v329_v48 = vadd.f32 %v328_v45, %v322_v40 }
  0x40   : > { %812 = vmatpush3.msra.mxu0 %v456_v33 }
  0x41   : > { %813 = vmatprep.subr.mxu0 %v1077_v9  ;;  %v310_v49 = vrot.slane %v309_v46, 4  ;;  %v330_v51 = vadd.f32 %v329_v48, %v323_v44 }
  0x42   : > { %814 = vmatpush3.msra.mxu0 %v455_v38 }
  0x43   : > { %815 = vmatprep.subr.mxu0 %v1077_v9  ;;  %v311_v52 = vadd.f32 %v310_v49, %v309_v46  ;;  %v331_v54 = vrot.slane %v330_v51, 4 }
  0x44   : > { %816 = vmatpush3.msra.mxu0 %v454_v43 }
  0x45   : > { %817 = vmatprep.subr.mxu0 %v1077_v9  ;;  %v312_v55 = vrot.slane %v311_v52, 2  ;;  %v332_v57 = vadd.f32 %v331_v54, %v330_v51 }
  0x46   : > { %818 = vmatpush3.msra.mxu0 %v453_v47 }
  0x47   : > { %819 = vmatprep.subr.mxu0 %v1077_v9  ;;  %v313_v58 = vadd.f32 %v312_v55, %v311_v52  ;;  %v333_v60 = vrot.slane %v332_v57, 2 }
  0x48   : > { %820 = vmatpush3.msra.mxu0 %v452_v50 }
  0x49   : > { %821 = vmatprep.subr.mxu0 %v1077_v9  ;;  %v314_v61 = vrot.slane %v313_v58, 1  ;;  %v334_v63 = vadd.f32 %v333_v60, %v332_v57 }
  0x4a   : > { %822 = vmatpush3.msra.mxu0 %v451_v53 }
  0x4b   : > { %823 = vmatprep.subr.mxu0 %v1077_v9  ;;  %v315_v0 = vadd.f32 %v314_v61, %v313_v58  ;;  %v335_v1 = vrot.slane %v334_v63, 1 }
  0x4c   : > { %824 = vmatpush3.msra.mxu0 %v450_v56 }
  0x4d   : > { %825 = vmatprep.subr.mxu0 %v1077_v9  ;;  %v337_v2 = vmul.f32 0.015625, %v315_v0  ;;  %v336_v3 = vadd.f32 %v335_v1, %v334_v63 }
  0x4e   : > { %826 = vmatpush3.msra.mxu0 %v449_v59 }
  0x4f   : > { %827 = vmatprep.subr.mxu0 %v1077_v9  ;;  %v338_v4 = vmul.f32 %v337_v2, %v315_v0  ;;  %v341_v12 = vsub.f32 %v1240_v13, %v337_v2  ;;  %v342_v16 = vsub.f32 %v1243_v14, %v337_v2  ;;  %v343_v17 = vsub.f32 %v1246_v15, %v337_v2 }
  0x50   : > { %828 = vmatpush3.msra.mxu0 %v448_v62  ;;  %v344_v9 = vsub.f32 %v1259_v20, %v337_v2  ;;  %v345_v18 = vsub.f32 %v1269_v24, %v337_v2  ;;  %v346_v19 = vsub.f32 %v1279_v29, %v337_v2  ;;  %v347_v21 = vsub.f32 %v1289_v34, %v337_v2 }
  0x51   : > { %v339_v5 = vsub.f32 %v336_v3, %v338_v4  ;;  %v348_v22 = vsub.f32 %v1299_v39, %v337_v2  ;;  %v349_v23 = vmul.f32 %v341_v12, %v341_v12  ;;  %v350_v25 = vmul.f32 %v342_v16, %v342_v16 }
  0x52   : > { %v351_v26 = vmul.f32 %v343_v17, %v343_v17  ;;  %v352_v27 = vmul.f32 %v344_v9, %v344_v9  ;;  %v353_v28 = vmul.f32 %v345_v18, %v345_v18  ;;  %v354_v30 = vmul.f32 %v346_v19, %v346_v19 }
  0x53   : > { %v340_v6 = vmax.f32 %v339_v5, 0.0  ;;  %v355_v31 = vmul.f32 %v347_v21, %v347_v21  ;;  %v356_v32 = vmul.f32 %v348_v22, %v348_v22 }
  0x55   : > { %v357_v8 = vmul.f32 0.015873017, %v340_v6 }
  0x57   : > { %v359_v10 = vadd.f32 %v358_v7, %v357_v8 }
  0x59   : > { %v360_v11 = vmul.f32 4.0, %v359_v10 }
  0x5b   : > { %929 = vrcp.f32 %v360_v11 }
  0x68   : > { %v930_v33 = vpop.eup %929 }
  0x69   : > { %v362_v35 = vmul.f32 %v930_v33, %v349_v23  ;;  %v363_v36 = vmul.f32 %v930_v33, %v350_v25  ;;  %v364_v37 = vmul.f32 %v930_v33, %v351_v26  ;;  %v365_v38 = vmul.f32 %v930_v33, %v352_v27 }
  0x6a   : > { %v366_v40 = vmul.f32 %v930_v33, %v353_v28  ;;  %v367_v41 = vmul.f32 %v930_v33, %v354_v30  ;;  %v368_v42 = vmul.f32 %v930_v33, %v355_v31  ;;  %v369_v43 = vmul.f32 %v930_v33, %v356_v32 }
  0x6b   : > { %v370_v44 = vadd.f32 0.5, %v362_v35  ;;  %v371_v45 = vadd.f32 0.5, %v363_v36  ;;  %v372_v46 = vadd.f32 0.5, %v364_v37  ;;  %v373_v47 = vadd.f32 0.5, %v365_v38 }
  0x6c   : > { %v374_v48 = vadd.f32 0.5, %v366_v40  ;;  %v375_v49 = vadd.f32 0.5, %v367_v41  ;;  %v376_v50 = vadd.f32 0.5, %v368_v42  ;;  %v377_v54 = vadd.f32 0.5, %v369_v43 }
  0x6d   : > { %v759_v51 = vmul.f32 -1.442695, %v370_v44  ;;  %v760_v52 = vmul.f32 -1.442695, %v371_v45  ;;  %v761_v53 = vmul.f32 -1.442695, %v372_v46 }
  0x6e   : > { %v762_v55 = vmul.f32 -1.442695, %v373_v47  ;;  %v763_v56 = vmul.f32 -1.442695, %v374_v48  ;;  %v764_v57 = vmul.f32 -1.442695, %v375_v49 }
  0x6f   : > { %931 = vpow2.f32 %v759_v51  ;;  %v765_v58 = vmul.f32 -1.442695, %v376_v50  ;;  %v766_v59 = vmul.f32 -1.442695, %v377_v54  ;;  %v616_v51 = vlaneseq }
  0x70   : > { %933 = vpow2.f32 %v760_v52 }
  0x71   : > { %935 = vpow2.f32 %v761_v53  ;;  %v617_v52 = vshrl.u32 %v616_v51, 7 }
  0x72   : > { %937 = vpow2.f32 %v762_v55 }
  0x73   : > { %939 = vpow2.f32 %v763_v56  ;;  %v618_v53 = vsub.s32 0, %v617_v52 }
  0x74   : > { %941 = vpow2.f32 %v764_v57 }
  0x75   : > { %943 = vpow2.f32 %v765_v58 }
  0x76   : > { %945 = vpow2.f32 %v766_v59 }
  0x7c   : > { %v932_v60 = vpop.eup %931 }
  0x7d   : > { %v934_v61 = vpop.eup %933  ;;  %v402_v62 = vadd.f32 1.0, %v932_v60 }
  0x7e   : > { %v936_v63 = vpop.eup %935  ;;  %v403_v0 = vadd.f32 1.0, %v934_v61 }
  0x7f   : > { %v938_v1 = vpop.eup %937  ;;  %v404_v2 = vadd.f32 1.0, %v936_v63  ;;  %947 = vrcp.f32 %v402_v62 }
  0x80   : > { %v940_v3 = vpop.eup %939  ;;  %v405_v4 = vadd.f32 1.0, %v938_v1  ;;  %949 = vrcp.f32 %v403_v0 }
  0x81   : > { %v942_v5 = vpop.eup %941  ;;  %v406_v6 = vadd.f32 1.0, %v940_v3  ;;  %951 = vrcp.f32 %v404_v2 }
  0x82   : > { %v944_v7 = vpop.eup %943  ;;  %v407_v8 = vadd.f32 1.0, %v942_v5  ;;  %953 = vrcp.f32 %v405_v4 }
  0x83   : > { %v946_v10 = vpop.eup %945  ;;  %v408_v11 = vadd.f32 1.0, %v944_v7  ;;  %955 = vrcp.f32 %v406_v6 }
  0x84   : > { %v409_v12 = vadd.f32 1.0, %v946_v10  ;;  %957 = vrcp.f32 %v407_v8 }
  0x85   : > { %959 = vrcp.f32 %v408_v11 }
  0x86   : > { %961 = vrcp.f32 %v409_v12 }
  0x8c   : > { %v948_v16 = vpop.eup %947 }
  0x8d   : > { %v950_v17 = vpop.eup %949  ;;  %v426_v9 = vmul.f32 %v948_v16, %v1240_v13 }
  0x8e   : > { %v952_v18 = vpop.eup %951  ;;  %v427_v19 = vmul.f32 %v950_v17, %v1243_v14 }
  0x8f   : > { %v954_v21 = vpop.eup %953  ;;  %v428_v22 = vmul.f32 %v952_v18, %v1246_v15 }
  0x90   : > { %v956_v23 = vpop.eup %955  ;;  %v429_v25 = vmul.f32 %v954_v21, %v1259_v20  ;;  %v434_v26 = vadd.f32 %v427_v19, %v426_v9 }
  0x91   : > { %v958_v27 = vpop.eup %957  ;;  %v430_v28 = vmul.f32 %v956_v23, %v1269_v24 }
  0x92   : > { %v435_v30 = vadd.f32 %v434_v26, %v428_v22  ;;  %v960_v31 = vpop.eup %959  ;;  %v431_v32 = vmul.f32 %v958_v27, %v1279_v29  ;;  %v535_v29 = vld [vmem:[%s1428_s3] sm:$0xff] }
  0x93   : > { %v962_v35 = vpop.eup %961  ;;  %v432_v13 = vmul.f32 %v960_v31, %v1289_v34  ;;  %833 = vmatpush3.msra.mxu1 %v535_v29 }
  0x94   : > { %v436_v33 = vadd.f32 %v435_v30, %v429_v25  ;;  %v433_v14 = vmul.f32 %v962_v35, %v1299_v39 }
  0x96   : > { %v437_v36 = vadd.f32 %v436_v33, %v430_v28 }
  0x98   : > { %v438_v37 = vadd.f32 %v437_v36, %v431_v32 }
  0x9a   : > { %v439_v15 = vadd.f32 %v438_v37, %v432_v13 }
  0x9c   : > { %v440_v38 = vadd.f32 %v439_v15, %v433_v14 }
  0x9e   : > { %v441_v40 = vrot.slane %v440_v38, 4 }
  0xa0   : > { %v442_v20 = vadd.f32 %v441_v40, %v440_v38 }
  0xa2   : > { %v443_v41 = vrot.slane %v442_v20, 2 }
  0xa4   : > { %v444_v42 = vadd.f32 %v443_v41, %v442_v20 }
  0xa6   : > { %v445_v43 = vrot.slane %v444_v42, 1 }
  0xa8   : > { %v446_v24 = vadd.f32 %v445_v43, %v444_v42 }
  0xaa   : > { %v447_v44 = vmul.f32 0.015625, %v446_v24 }
  0xac   : > { %830 = vmatmul.mubr.f32.vlgmr.msra.gmra.mxu0 %v447_v44 }
 0x16c   : > { %v530_v34 = vpop.f32.mrf.mxu0 }
 0x16d   : > { %v534_v39 = vmax.f32 %v530_v34, 0.0 }
 0x16e   : > { %v831_v45 = vpop.f32.mrf.mxu0 }
 0x16f   : > { %835 = vmatmul.mubr.msk.f32.vlgmr.msra.gmra.mxu1 %vm536_vm1, %v534_v39 }
 0x22f   : > { %v606_v46 = vpop.f32.mrf.mxu1 }
 0x230   : > { %v768_v47 = vmul.f32 -1.442695, %v606_v46 }
 0x231   : > { %v836_v48 = vpop.f32.mrf.mxu1 }
 0x232   : > { %963 = vpow2.f32 %v768_v47 }
 0x23f   : > { %v964_v49 = vpop.eup %963 }
 0x240   : > { %v613_v50 = vadd.f32 1.0, %v964_v49 }
 0x242   : > { %965 = vrcp.f32 %v613_v50 }
 0x24f   : > { %v966_v54 = vpop.eup %965 }
 0x250   : > { %v619_v55 = vrot.slane %v966_v54, %v618_v53 }
 0x252   : > { %v620_v56 = vmul.f32 %v619_v55, %v426_v9  ;;  %v621_v57 = vmul.f32 %v619_v55, %v427_v19  ;;  %v622_v58 = vmul.f32 %v619_v55, %v428_v22  ;;  %v623_v59 = vmul.f32 %v619_v55, %v429_v25 }
 0x253   : > { %v624_v60 = vmul.f32 %v619_v55, %v430_v28  ;;  %v625_v61 = vmul.f32 %v619_v55, %v431_v32  ;;  %v626_v62 = vmul.f32 %v619_v55, %v432_v13  ;;  %v627_v63 = vmul.f32 %v619_v55, %v433_v14 }
 0x254   : > { %628 = vst [vmem:[%s291_s11] sm:$0xff] %v620_v56  ;;  %629 = vst [vmem:[%s291_s11 + $0x8] sm:$0xff] %v621_v57 }
 0x255   : > { %630 = vst [vmem:[%s291_s11 + $0x10] sm:$0xff] %v622_v58  ;;  %631 = vst [vmem:[%s291_s11 + $0x18] sm:$0xff] %v623_v59 }
 0x256   : > { %632 = vst [vmem:[%s291_s11 + $0x20] sm:$0xff] %v624_v60  ;;  %633 = vst [vmem:[%s291_s11 + $0x28] sm:$0xff] %v625_v61 }
 0x257   : > { %634 = vst [vmem:[%s291_s11 + $0x30] sm:$0xff] %v626_v62  ;;  %635 = vst [vmem:[%s291_s11 + $0x38] sm:$0xff] %v627_v63 }
 0x258   : > { %980 = shalt.err (!%p977_p9)
}
 0x259   : > { %s981_s7 = scalar_lea.hbm %s1362_s28, 1024  ;;  %s985_s11 = scalar_lea.hbm %s1429_s4, 8192 }
 0x25a   : > { %p982_p11 = scmp.ne.s32.totalorder %s1362_s28, %s981_s7  ;;  %p986_p0 = scmp.lt.s32.totalorder %s1362_s28, %s1429_s4 }
 0x25b   : > { %p987_p1 = scmp.lt.s32.totalorder %s985_s11, %s981_s7 }
 0x25c   : > { %p983_p12 = pnand %p982_p11, %p1179_p6 }
 0x25d   : > { %p988_p2 = por %p987_p1, %p986_p0 }
 0x25e   : > { %p984_p13 = pneg %p983_p12 }
 0x260   : > { %p989_p3 = pnand %p988_p2, %p984_p13 }
 0x262   : > { %992 = shalt.err (!%p989_p3)
}
 0x263   : > { %s1080_s20 = smov 128   ;;  %s1081_s22 = smov 256  }
 0x264   : > { %s1082_s8 = smov 8  }
 0x265   : > { %837 = dma.vmem_to_hbm [thread:$0]  (%p1179_p6), %s1364_s12, 1024, %s1362_s28, %s1368_s21, %s1080_s20, %s1081_s22, %s1082_s8  }
 0x266 PF: > { %p843_p4 = scmp.ge.s32.totalorder %s1075_s0, 2  ;;  %s669_s16 = sand.u32 1, %s1039_s17  }
 0x267   : > { %s670_s30 = scalar_lea.sflag [#allocation5], %s669_s16 }
 0x268   : > { %p840_p5 = pnand %p843_p4, %p1191_p10 }
 0x26a   : > { %p841_p7 = pneg %p840_p5 }
 0x26c   : > { %1034 = dma.done.wait (%p841_p7), %s670_s30, 1024  }
 0x26d   : > { %1036 = vsyncadd (%p841_p7), %s670_s30, 4294966272  ;;  %s18_s0 = sadd.s32 1, %s1075_s0   ;;  %s1435_s17 = smov %s1043_s18 }
 0x26e   : > { %p15_p8 = scmp.ge.s32.totalorder %s18_s0, 10   ;;  %s1436_s18 = smov %s1047_s19 }
 0x26f   : > { %s1437_s19 = smov %s1199_s14  ;;  %s1438_s20 = smov %s1063_s23 }
 0x270   : > { %s1439_s21 = smov %s1067_s24  ;;  %s1440_s22 = smov %s1071_s25 }
 0x271   : > { %s1441_s23 = smov %s1445_s26  ;;  %s1442_s24 = smov %s1449_s27 }
 0x272   : > { %s1443_s25 = smov %s1453_s29  ;;  %17 = sbr.rel (!%p15_p8) target bundleno = 8 (0x8), region = 114 }
 0x277   :  { %675 = vsyncpa [#allocation5], 1 }
 0x278   :  { %677 = vsyncpa [#allocation5 + $0x1], 1 }

</bundles_post_ra>
